<compile_context>
chip_gen: v6e
topology: v6e:2x2x1
jax: 0.10.0
libtpu: 0.0.40
codegen_flags: <defaults>
</compile_context>

<pallas_src>
import functools

import jax
import jax.numpy as jnp
from jax import lax
from jax.experimental import pallas as pl
from jax.experimental.pallas import tpu as pltpu


def _landmark_kernel(x_ref, w_ref, b_ref, o_ref):
    # x_ref: (Cin, tS)  one batch element, one spatial tile (lanes = pixels)
    # w_ref: (Cout, Cin) resident weight; b_ref: (Cout, 1) resident bias
    # o_ref: (Cout, tS)  lane-dense output tile
    acc = lax.dot_general(
        w_ref[...], x_ref[...],
        dimension_numbers=(((1,), (0,)), ((), ())),
        preferred_element_type=jnp.float32)
    o_ref[...] = (acc + b_ref[...]).astype(o_ref.dtype)


@functools.partial(jax.jit, static_argnames=("t_s",))
def _conv1x1_nchw(x3d, w, b2d, *, t_s):
    """x3d: (N, Cin, S_pad), w: (Cout, Cin), b2d: (Cout, 1) -> (N, Cout, S_pad)."""
    N, Cin, S = x3d.shape
    Cout = w.shape[0]
    grid = (N, S // t_s)

    itemsize = jnp.dtype(x3d.dtype).itemsize
    cost = pl.CostEstimate(
        flops=2 * N * S * Cin * Cout,
        transcendentals=0,
        bytes_accessed=(N * S * Cin * itemsize      # activation read
                        + N * S * Cout * itemsize   # output write
                        + Cout * Cin * 4 + Cout * 4))

    return pl.pallas_call(
        _landmark_kernel,
        out_shape=jax.ShapeDtypeStruct((N, Cout, S), x3d.dtype),
        grid_spec=pltpu.PrefetchScalarGridSpec(
            num_scalar_prefetch=0,
            grid=grid,
            in_specs=[
                # batch dim squeezed; tile the spatial (lane) axis
                pl.BlockSpec((None, Cin, t_s), lambda n, s: (n, 0, s)),
                pl.BlockSpec((Cout, Cin), lambda n, s: (0, 0)),  # resident weight
                pl.BlockSpec((Cout, 1), lambda n, s: (0, 0)),    # resident bias
            ],
            out_specs=pl.BlockSpec((None, Cout, t_s), lambda n, s: (n, 0, s)),
        ),
        compiler_params=pltpu.CompilerParams(
            dimension_semantics=("parallel", "parallel"),
            vmem_limit_bytes=32 * 1024 * 1024),
        cost_estimate=cost,
    )(x3d, w, b2d)


def landmark_head_forward(x_nchw, weight, bias, *, num_anchors=3,
                          tile_spatial=512):
    """x_nchw: (N, Cin, H, W); weight: (Cout, Cin) [1x1 conv kernel squeezed];
    bias: (Cout,).  Returns (N, H*W*num_anchors, 10)."""
    N, Cin, H, W = x_nchw.shape
    Cout = weight.shape[0]
    assert Cout == num_anchors * 10

    S = H * W
    x3d = x_nchw.reshape(N, Cin, S)          # free: identical memory layout

    # Spatial tile: a multiple of 128 lanes, capped at the (128-padded) extent.
    # Always pad S up to a multiple of t_s — never fall back to one giant block.
    t_s = max(128, (int(tile_spatial) // 128) * 128)
    s_pad128 = ((S + 127) // 128) * 128
    t_s = min(t_s, s_pad128)
    S_pad = ((S + t_s - 1) // t_s) * t_s
    if S_pad != S:
        x3d = jnp.pad(x3d, ((0, 0), (0, 0), (0, S_pad - S)))

    # TODO(synk): for v6e/v7x, optionally cast x3d/weight to bfloat16 here
    # (f32 accumulation via preferred_element_type) to halve HBM read traffic.
    b2d = bias.reshape(Cout, 1)
    out = _conv1x1_nchw(x3d, weight, b2d, t_s=t_s)   # (N, Cout, S_pad)
    out = out[:, :, :S]                              # drop spatial padding

    # Cheap permute of the SMALL output (30 ch/pixel), matching
    # permute(0, 2, 3, 1).contiguous().view(N, -1, 10) in the PyTorch module.
    out = jnp.transpose(out, (0, 2, 1))              # (N, S, Cout)
    return out.reshape(N, S * num_anchors, 10)


if __name__ == "__main__":
    # Small shapes consistent with the module (inchannels scaled down).
    N, Cin, H, W = 2, 32, 16, 16
    num_anchors = 3
    Cout = num_anchors * 10

    key = jax.random.PRNGKey(0)
    kx, kw, kb = jax.random.split(key, 3)
    x = jax.random.normal(kx, (N, Cin, H, W), dtype=jnp.float32)
    # Deterministic synthetic conv1x1 parameters (shapes from nn.Conv2d).
    weight = jax.random.normal(kw, (Cout, Cin), dtype=jnp.float32) * 0.05
    bias = jax.random.normal(kb, (Cout,), dtype=jnp.float32) * 0.01

    out = landmark_head_forward(x, weight, bias, num_anchors=num_anchors)
    out = jax.block_until_ready(out)

    # Reference check against plain-JAX 1x1 conv semantics.
    ref = jnp.einsum("nchw,oc->nhwo", x, weight) + bias
    ref = ref.reshape(N, H * W * num_anchors, 10)
    assert out.shape == (N, H * W * num_anchors, 10), out.shape
    assert jnp.allclose(out, ref, atol=1e-4, rtol=1e-4), \
        float(jnp.max(jnp.abs(out - ref)))

    print("KERNEL_OK")
</pallas_src>

<mosaic_0001>
module attributes {stable_mosaic.version = 11 : i64} {
  func.func @_landmark_kernel(%arg0: i32, %arg1: i32, %arg2: memref<1x32x256xf32, #tpu.memory_space<vmem>>, %arg3: memref<30x32xf32, #tpu.memory_space<vmem>>, %arg4: memref<30x1xf32, #tpu.memory_space<vmem>>, %arg5: memref<1x30x256xf32, #tpu.memory_space<vmem>>) attributes {dimension_semantics = [#tpu.dimension_semantics<parallel>, #tpu.dimension_semantics<parallel>], iteration_bounds = array<i64: 2, 1>, scalar_prefetch = 0 : i64, scratch_operands = 0 : i64, tpu.core_type = #tpu.core_type<tc>, window_params = [{transform_indices = @transform_0, window_bounds = array<i64: 1, 32, 256>}, {pipeline_mode = #tpu.pipeline_mode<synchronous>, transform_indices = @transform_1, window_bounds = array<i64: 30, 32>}, {pipeline_mode = #tpu.pipeline_mode<synchronous>, transform_indices = @transform_2, window_bounds = array<i64: 30, 1>}, {transform_indices = @transform_3, window_bounds = array<i64: 1, 30, 256>}]} {
    %c0 = arith.constant 0 : index
    %c0_0 = arith.constant 0 : index
    %0 = vector.load %arg3[%c0, %c0_0] : memref<30x32xf32, #tpu.memory_space<vmem>>, vector<30x32xf32>
    %c0_1 = arith.constant 0 : index
    %c0_2 = arith.constant 0 : index
    %c0_3 = arith.constant 0 : index
    %1 = vector.load %arg2[%c0_1, %c0_2, %c0_3] : memref<1x32x256xf32, #tpu.memory_space<vmem>>, vector<1x32x256xf32>
    %2 = vector.shape_cast %1 : vector<1x32x256xf32> to vector<32x256xf32>
    %cst = arith.constant dense<0.000000e+00> : vector<30x256xf32>
    %3 = tpu.matmul %0, %2, %cst {dimension_numbers = #tpu.dot_dimension_numbers<[1], [0], [0], [1], [0, 0, 1, 1], [], []>} : vector<30x32xf32>, vector<32x256xf32>, vector<30x256xf32> -> vector<30x256xf32>
    %c0_4 = arith.constant 0 : index
    %c0_5 = arith.constant 0 : index
    %4 = vector.load %arg4[%c0_4, %c0_5] : memref<30x1xf32, #tpu.memory_space<vmem>>, vector<30x1xf32>
    %5 = vector.broadcast %4 : vector<30x1xf32> to vector<30x256xf32>
    %6 = arith.addf %3, %5 : vector<30x256xf32>
    %c0_6 = arith.constant 0 : index
    %c0_7 = arith.constant 0 : index
    %c0_8 = arith.constant 0 : index
    %7 = vector.load %arg5[%c0_6, %c0_7, %c0_8] : memref<1x30x256xf32, #tpu.memory_space<vmem>>, vector<1x30x256xf32>
    %8 = vector.shape_cast %7 : vector<1x30x256xf32> to vector<30x256xf32>
    %9 = vector.shape_cast %6 : vector<30x256xf32> to vector<1x30x256xf32>
    tpu.vector_store %arg5[%c0_6, %c0_7, %c0_8], %9 {strides = array<i32>} : memref<1x30x256xf32, #tpu.memory_space<vmem>>, vector<1x30x256xf32>,
    return
  }
  func.func @transform_0(%arg0: i32, %arg1: i32) -> (i32, i32, i32) {
    %c0_i32 = arith.constant 0 : i32
    %c0_i32_0 = arith.constant 0 : i32
    return %arg0, %c0_i32, %arg1 : i32, i32, i32
  }
  func.func @transform_1(%arg0: i32, %arg1: i32) -> (i32, i32) {
    %c0_i32 = arith.constant 0 : i32
    %c0_i32_0 = arith.constant 0 : i32
    %c0_i32_1 = arith.constant 0 : i32
    return %c0_i32, %c0_i32_0 : i32, i32
  }
  func.func @transform_2(%arg0: i32, %arg1: i32) -> (i32, i32) {
    %c0_i32 = arith.constant 0 : i32
    %c0_i32_0 = arith.constant 0 : i32
    %c0_i32_1 = arith.constant 0 : i32
    return %c0_i32, %c0_i32_0 : i32, i32
  }
  func.func @transform_3(%arg0: i32, %arg1: i32) -> (i32, i32, i32) {
    %c0_i32 = arith.constant 0 : i32
    %c0_i32_0 = arith.constant 0 : i32
    return %arg0, %c0_i32, %arg1 : i32, i32, i32
  }
}

</mosaic_0001>

<bundles_post_ra>
// kernel: _conv1x1_nchw.1
= control target key start
LH: loop header
LB: loop body
LE: loop exit
PB: predicated region body
PF: predicated region fallthrough
CT: control target
= control target key end

     0   :  { %8 = vsyncpa [#allocation3], 0  ;;  %s777_s0 = inlined_call_operand.hbm [shape: f32[2,32,256], index: 0, kind: input, shape index: {}]   ;;  %s778_s1 = inlined_call_operand.vmem [shape: f32[30,32], index: 1, kind: input, shape index: {}]   ;;  %s779_s2 = inlined_call_operand.vmem [shape: f32[30,1], index: 2, kind: input, shape index: {}]   ;;  %s780_s3 = inlined_call_operand.vmem [shape: f32[2,30,256], index: 3, kind: output, shape index: {}]  }
   0x1   :  { %10 = vsyncpa [#allocation3 + $0x1], 0  ;;  %s653_s12 = smov 0   ;;  %s655_s13 = smov 0  }
   0x2   :  { %s657_s14 = smov 0   ;;  %s659_s15 = smov 0  }
   0x3   :  { %s661_s16 = smov 0   ;;  %s663_s17 = smov 0  }
   0x4 LB: > { %s460_s18 = sadd.s32 4294967295, %s626_s17   ;;  %s28_s19 = sadd.s32 1, %s622_s16  ;;  %s626_s17 = sphi %s663_s17, %s16_s17   ;;  %s622_s16 = sphi %s661_s16, %s788_s16   ;;  %s618_s15 = sphi %s659_s15, %s787_s15   ;;  %s614_s14 = sphi %s657_s14, %s786_s14   ;;  %s610_s13 = sphi %s655_s13, %s785_s13   ;;  %s606_s12 = sphi %s653_s12, %s784_s12  }
   0x5   : > { %p30_p0 = scmp.ge.s32.totalorder %s28_s19, 2  ;;  %s37_s20 = sadd.s32 1, %s614_s14 }
   0x6   : > { %p44_p1 = scmp.ne.s32.totalorder %s614_s14, %s610_s13  ;;  %p45_p2 = scmp.eq.s32.totalorder %s626_s17, 0 }
   0x7   : > { %s790_s19 = smov (%p30_p0, %s28_s19), 0  ;;  %p50_p4 = scmp.ne.s32.totalorder %s610_s13, %s606_s12 }
   0x8   : > { %p689_p3 = por %p45_p2, %p44_p1  ;;  %s32_s22 = ssub.s32 %s622_s16, %s790_s19 }
   0x9   : > { %p51_p5 = scmp.eq.s32.totalorder %s460_s18, 0  ;;  %p35_p6 = scmp.eq.s32.totalorder %s32_s22, 0 }
   0xa   : > { %p493_p8 = scmp.lt.s32.totalorder %s626_s17, 2  ;;  %s150_s25 = sand.u32 1, %s614_s14  }
   0xb   : > { %p696_p7 = por %p51_p5, %p50_p4  ;;  %s477_s26 = sshll.u32 %s622_s16, 10 }
   0xc   : > { %s702_s24 = scalar_select %p35_p6, %s614_s14, %s37_s20  }
   0xd   : > { %s464_s27 = sshll.u32 %s150_s25, 6  ;;  %s162_s30 = scalar_lea.hbm %s777_s0, %s477_s26 }
   0xe   : > { %s154_s4 = scalar_lea.vmem [#allocation2], %s464_s27  ;;  %p711_p9 = pnand %p493_p8, %p689_p3 }
   0xf   : > { %s163_s5 = sshll.u32 %s154_s4, 4  ;;  %s151_s7 = scalar_lea.sflag [#allocation3], %s150_s25  ;;  %s164_s5 = int_to_ptr.vmem [resolvable:$true] %s163_s5 }
  0x10   : > { %p550_p10 = pneg %p711_p9  ;;  %s561_s8 = scalar_lea.vmem %s164_s5, 1024 }
  0x11   : > { %p562_p11 = scmp.ne.s32.totalorder %s164_s5, %s561_s8  ;;  %s628_s9 = smov [#allocation2]  }
  0x12   : > { %s566_s10 = sshll.u32 %s628_s9, 4  ;;  %s567_s10 = int_to_ptr.vmem [resolvable:$false] %s566_s10 }
  0x13   : > { %p564_p12 = pnand %p562_p11, %p550_p10  ;;  %s568_s11 = scalar_lea.vmem %s567_s10, 2048 }
  0x14   : > { %p569_p0 = scmp.lt.s32.totalorder %s164_s5, %s567_s10  ;;  %p570_p1 = scmp.lt.s32.totalorder %s568_s11, %s561_s8 }
  0x15   : > { %p565_p13 = pneg %p564_p12 }
  0x16   : > { %p571_p2 = por %p570_p1, %p569_p0 }
  0x18   : > { %p572_p3 = pnand %p571_p2, %p565_p13 }
  0x1a   : > { %575 = shalt.err (!%p572_p3)
}
  0x1b   : > { %s629_s12 = smov 256   ;;  %s630_s18 = smov 16  }
  0x1c   : > { %492 = dma.hbm_to_vmem [thread:$0]  (!%p711_p9), %s162_s30, 1024, %s164_s5, %s151_s7, %s629_s12, %s629_s12, %s630_s18  }
  0x1d   : > { %p467_p4 = scmp.ge.s32.totalorder %s626_s17, 1  ;;  %p171_p5 = scmp.lt.s32.totalorder %s626_s17, 3 }
  0x1f   : > { %p172_p6 = pnand %p467_p4, %p171_p5 }
  0x20   : > { %s177_s20 = sand.u32 (!%p172_p6), 1, %s610_s13  }
  0x21   : > { %175 = sbr.rel (%p172_p6) target bundleno = 252 (0xfc), region = 32  ;;  %s468_s21 = sshll.u32 (!%p172_p6), %s177_s20, 6 }
  0x22   : > { %s178_s22 = scalar_lea.sflag (!%p172_p6), [#allocation3], %s177_s20  ;;  %s181_s25 = scalar_lea.vmem (!%p172_p6), [#allocation2], %s468_s21 }
  0x26   : > { %601 = dma.done.wait (%p696_p7), %s178_s22, 1024  }
  0x27   : > { %603 = vsyncadd (%p696_p7), %s178_s22, 4294966272  ;;  %v631_v0 = vmov 0.0   ;;  %v632_v1 = vmov 0   ;;  %v230_v2 = vld [vmem:[%s181_s25 + $0x38] sm:$0xff]  ;;  %v229_v3 = vld [vmem:[%s181_s25 + $0x30] sm:$0xff]  ;;  %vm255_vm0 = vcmask 261120  }
  0x28   : > { %332 = vmatprep.mubr.f32.mxu0 %v631_v0  ;;  %344 = vmatprep.mubr.f32.mxu1 %v631_v0  ;;  %v228_v4 = vld [vmem:[%s181_s25 + $0x28] sm:$0xff]  ;;  %v227_v5 = vld [vmem:[%s181_s25 + $0x20] sm:$0xff]  ;;  %v226_v6 = vld [vmem:[%s181_s25 + $0x18] sm:$0xff]  ;;  %p210_p7 = scmp.lt.s32.totalorder %s618_s15, 1 }
  0x29   : > { %547 = vset.pattern.permute.xlu1 %v632_v1  ;;  %546 = vset.pattern.permute.xlu0 %v632_v1  ;;  %v225_v7 = vld [vmem:[%s181_s25 + $0x10] sm:$0xff]  ;;  %v224_v8 = vld [vmem:[%s181_s25 + $0x8] sm:$0xff]  ;;  %v223_v9 = vld [vmem:[%s181_s25] sm:$0xff] }
  0x2a   : > { %292 = vmatprep.subr.mxu0 %v230_v2  ;;  %479 = vmatprep.subr.mxu1 %v230_v2  ;;  %v219_v10 = vld [vmem:[%s778_s1] sm:$0xff]  ;;  %v221_v11 = vld [vmem:[%s778_s1 + $0x10] sm:$0xff]  ;;  %v220_v14 = vld [vmem:[%s778_s1 + $0x8] sm:$0xff]  ;;  %s792_s15 = smov (!%p210_p7, %s618_s15), 1 }
  0x2b   : > { %293 = vmatpush1.msra.mxu0 %v229_v3  ;;  %483 = vmatpush1.msra.mxu1 %v229_v3  ;;  %v233_v12 = vld [vmem:[%s779_s2 + $0x10] sm:$0xff]  ;;  %v231_v13 = vld [vmem:[%s779_s2] sm:$0xff]  ;;  %v222_v15 = vld [vmem:[%s778_s1 + $0x18] sm:$0x3f]  ;;  %s478_s20 = sshll.u32 %s792_s15, 6 }
  0x2c   : > { %294 = vmatprep.subr.mxu0 %v228_v4  ;;  %480 = vmatprep.subr.mxu1 %v228_v4  ;;  %v234_v16 = vld [vmem:[%s779_s2 + $0x18] sm:$0x3f]  ;;  %v232_v17 = vld [vmem:[%s779_s2 + $0x8] sm:$0xff]  ;;  %s217_s25 = scalar_lea.vmem %s780_s3, %s478_s20 }
  0x2d   : > { %295 = vmatpush1.msra.mxu0 %v227_v5  ;;  %484 = vmatpush1.msra.mxu1 %v227_v5 }
  0x2e   : > { %296 = vmatprep.subr.mxu0 %v226_v6  ;;  %481 = vmatprep.subr.mxu1 %v226_v6 }
  0x2f   : > { %297 = vmatpush1.msra.mxu0 %v225_v7  ;;  %485 = vmatpush1.msra.mxu1 %v225_v7 }
  0x30   : > { %298 = vmatprep.subr.mxu0 %v224_v8  ;;  %482 = vmatprep.subr.mxu1 %v224_v8 }
  0x31   : > { %299 = vmatpush1.msra.mxu0 %v223_v9  ;;  %486 = vmatpush1.msra.mxu1 %v223_v9 }
  0x32   : > { %471 = vmatmul.mubr.msk.f32.vlgmr.msra.gmra.mxu0 %vm255_vm0, %v219_v10  ;;  %473 = vmatmul.mubr.msk.f32.vlgmr.msra.gmra.mxu1 %vm255_vm0, %v221_v11 }
  0x33   : > { %338 = vmatprep.mubr.f32.mxu0 %v631_v0  ;;  %350 = vmatprep.mubr.f32.mxu1 %v631_v0 }
  0x34   : > { %247 = vperm.xlu1 %547, %v233_v12   ;;  %237 = vperm.xlu0 %546, %v231_v13  }
  0x36   : > { %472 = vmatmul.mubr.msk.f32.gmra.mxu0 %vm255_vm0, %v220_v14  ;;  %474 = vmatmul.mubr.msk.f32.gmra.mxu1 %vm255_vm0, %v222_v15 }
  0x38   : > { %252 = vperm.xlu1 %547, %v234_v16   ;;  %242 = vperm.xlu0 %546, %v232_v17  }
  0xaf   : > { %v248_v18 = vpop.permute.xlu1 %247  ;;  %v238_v19 = vpop.permute.xlu0 %237 }
  0xb3   : > { %v253_v26 = vpop.permute.xlu1 %252  ;;  %v243_v27 = vpop.permute.xlu0 %242 }
  0xf2   : > { %v334_v20 = vpop.f32.mrf.mxu0  ;;  %v346_v21 = vpop.f32.mrf.mxu1 }
  0xf3   : > { %v335_v22 = vadd.f32 %v334_v20, %v238_v19  ;;  %v347_v23 = vadd.f32 %v346_v21, %v248_v18 }
  0xf4   : > { %v336_v24 = vpop.f32.mrf.mxu0  ;;  %v348_v25 = vpop.f32.mrf.mxu1 }
  0xf5   : > { %357 = vst [vmem:[%s217_s25] sm:$0xff] %v335_v22  ;;  %361 = vst [vmem:[%s217_s25 + $0x20] sm:$0xff] %v347_v23  ;;  %v337_v28 = vadd.f32 %v336_v24, %v238_v19  ;;  %v349_v29 = vadd.f32 %v348_v25, %v248_v18 }
  0xf6   : > { %v340_v30 = vpop.f32.mrf.mxu0  ;;  %v352_v31 = vpop.f32.mrf.mxu1 }
  0xf7   : > { %358 = vst [vmem:[%s217_s25 + $0x8] sm:$0xff] %v337_v28  ;;  %362 = vst [vmem:[%s217_s25 + $0x28] sm:$0xff] %v349_v29  ;;  %v341_v32 = vadd.f32 %v340_v30, %v243_v27  ;;  %v353_v33 = vadd.f32 %v352_v31, %v253_v26 }
  0xf8   : > { %v342_v34 = vpop.f32.mrf.mxu0  ;;  %v354_v35 = vpop.f32.mrf.mxu1 }
  0xf9   : > { %359 = vst [vmem:[%s217_s25 + $0x10] sm:$0xff] %v341_v32  ;;  %363 = vst [vmem:[%s217_s25 + $0x30] sm:$0x3f] %v353_v33  ;;  %v343_v36 = vadd.f32 %v342_v34, %v243_v27  ;;  %v355_v37 = vadd.f32 %v354_v35, %v253_v26 }
  0xfb   : > { %360 = vst [vmem:[%s217_s25 + $0x18] sm:$0xff] %v343_v36  ;;  %364 = vst [vmem:[%s217_s25 + $0x38] sm:$0x3f] %v355_v37 }
  0xfc PF: > { %s16_s17 = sadd.s32 1, %s626_s17   ;;  %s784_s12 = smov %s610_s13 }
  0xfd   : > { %p13_p8 = scmp.ge.s32.totalorder %s16_s17, 4   ;;  %s785_s13 = smov %s614_s14 }
  0xfe   : > { %s786_s14 = smov %s702_s24  ;;  %s787_s15 = smov %s622_s16 }
  0xff   : > { %s788_s16 = smov %s790_s19  ;;  %15 = sbr.rel (!%p13_p8) target bundleno = 4 (0x4), region = 72 }
 0x104   :  { %395 = vsyncpa [#allocation3], 1 }
 0x105   :  { %397 = vsyncpa [#allocation3 + $0x1], 1 }

</bundles_post_ra>
